<compile_context>
chip_gen: v7x
topology: tpu7x:2x2x1
jax: 0.10.0
libtpu: 0.0.40
codegen_flags: <defaults>
</compile_context>

<pallas_src>
import jax
import jax.numpy as jnp
import numpy as np
from jax.experimental import pallas as pl
from jax.experimental.pallas import tpu as pltpu


def _spatial_attention_kernel(l_ref, wbar_ref, out_ref):
    # l_ref:    (TN, C, HW)    batch tile of activations (native dtype)
    # wbar_ref: (classes, HW)  precomputed per-class weight means (resident)
    # out_ref:  (TN, HW)       lane-dense output slab
    _, C, _ = l_ref.shape
    classes = wbar_ref.shape[0]
    inv_c = jnp.float32(1.0 / C)
    inv_cls = jnp.float32(1.0 / classes)

    # channel mean of l, accumulated in f32 (supports bf16 inputs too)
    lbar = jnp.sum(l_ref[...].astype(jnp.float32), axis=1) * inv_c        # (TN, HW)

    # cam[n, c, hw] = wbar[c, hw] * mean_ch(l)[n, hw]  (== mean_ch(wbar * l))
    cam = lbar[:, None, :] * wbar_ref[...][None, :, :]                    # (TN, cls, HW)

    # per-sample, per-class spatial min/max normalization.  min & max act on the
    # unshifted cam (no serial dep through the subtract); the divide becomes an
    # EUP reciprocal; eps guards range == 0 (constant cam / padded rows).
    mn = jnp.min(cam, axis=-1, keepdims=True)
    mx = jnp.max(cam, axis=-1, keepdims=True)
    inv_rng = pl.reciprocal(jnp.maximum(mx - mn, 1e-30), approx=True)
    cam = (cam - mn) * inv_rng

    # mean over classes -> (TN, HW), full-width unmasked stores
    out_ref[...] = (jnp.sum(cam, axis=1) * inv_cls).astype(out_ref.dtype)


def _pick_batch_tile(n, c, hw, classes, itemsize):
    """Batch tile TN: multiple of 8, VMEM-sized for v7x, >=2 grid steps when N allows."""
    n8 = ((n + 7) // 8) * 8
    per_sample = (2 * c * hw * itemsize        # double-buffered l tile
                  + classes * hw * 4           # in-kernel (TN, classes, HW) f32 temp
                  + 2 * hw * 4)                # double-buffered output rows
    budget = 24 * 1024 * 1024                  # well under v7x 64 MiB physical VMEM
    tn = max(8, min(128, (budget // max(per_sample, 1)) // 8 * 8))
    if n8 >= 16:                               # keep >=2 steps for v7x's 2 TensorCores
        tn = min(tn, max(8, (n8 // 2) // 8 * 8))
    return min(tn, n8)


def spatial_attention_block_f(l, w, classes):
    """l: (N, C, H, W), w: (classes, K*H*W).  Returns (N, 1, H, W) in l.dtype."""
    N, C, H, W = l.shape
    HW = H * W
    assert w.shape[0] == classes and w.shape[1] % HW == 0
    K = w.shape[1] // HW

    # One-time, tiny: per-class mean over the K reshaped weight rows (f32).
    wbar = jnp.mean(w.reshape(classes, K, HW).astype(jnp.float32), axis=1)

    # Contiguous reshape only; keep native dtype (no extra f32 copy of l in HBM).
    l3 = l.reshape(N, C, HW)

    tn = _pick_batch_tile(N, C, HW, classes, jnp.dtype(l3.dtype).itemsize)
    n_pad = ((N + tn - 1) // tn) * tn
    if n_pad != N:
        # zero-pad the batch tail tile; padded rows normalize to 0 (eps guard)
        # and are sliced off below.
        l3 = jnp.pad(l3, ((0, n_pad - N), (0, 0), (0, 0)))

    grid_spec = pltpu.PrefetchScalarGridSpec(
        num_scalar_prefetch=0,
        grid=(n_pad // tn,),
        in_specs=[
            pl.BlockSpec((tn, C, HW), lambda i: (i, 0, 0)),        # l batch tile
            pl.BlockSpec((classes, HW), lambda i: (0, 0)),         # wbar (resident)
        ],
        out_specs=pl.BlockSpec((tn, HW), lambda i: (i, 0)),
    )

    out = pl.pallas_call(
        _spatial_attention_kernel,
        out_shape=jax.ShapeDtypeStruct((n_pad, HW), l.dtype),
        grid_spec=grid_spec,
        compiler_params=pltpu.CompilerParams(
            dimension_semantics=("parallel",),       # batch tiles shard on v7x megacore
            vmem_limit_bytes=48 * 1024 * 1024,       # > default scoped, < v7x 64 MiB
        ),
    )(l3, wbar)

    return out[:N].reshape(N, 1, H, W)


def spatial_attention_block_f_reference(l, w, classes):
    """Pure-JAX reference mirroring the PyTorch loop exactly."""
    N, C, H, W = l.shape
    cams = []
    for idx in range(classes):
        weights = w[idx, :].reshape(-1, H, W)
        weights = jnp.mean(weights, axis=0, keepdims=True)     # (1, H, W)
        cam = weights * l                                      # (N, C, H, W)
        cam = jnp.mean(cam, axis=1, keepdims=True)             # (N, 1, H, W)
        cam = cam - jnp.min(cam, axis=(2, 3), keepdims=True)
        cam = cam / jnp.max(cam, axis=(2, 3), keepdims=True)
        cams.append(cam)
    out = jnp.concatenate(cams, axis=1)                        # (N, classes, H, W)
    return jnp.mean(out, axis=1, keepdims=True)


if __name__ == "__main__":
    # small shapes consistent with the module: l is NCHW, w is (classes, C*H*W)
    N, C, H, W = 2, 4, 16, 16
    classes = 4
    K = C

    key = jax.random.PRNGKey(0)
    k1, k2 = jax.random.split(key)
    l = jax.random.normal(k1, (N, C, H, W), jnp.float32)
    w = jax.random.normal(k2, (classes, K * H * W), jnp.float32)

    out = spatial_attention_block_f(l, w, classes)
    out = jax.block_until_ready(out)

    ref = spatial_attention_block_f_reference(l, w, classes)
    # Tolerance covers the EUP approximate reciprocal used for the 1/(max-min)
    # normalization; outputs are normalized to [0, 1].
    np.testing.assert_allclose(np.asarray(out), np.asarray(ref),
                               rtol=2e-3, atol=2e-3)
    print("KERNEL_OK")
</pallas_src>

<mosaic_0001>
module attributes {stable_mosaic.version = 11 : i64} {
  func.func @_spatial_attention_kernel(%arg0: i32, %arg1: memref<8x4x256xf32, #tpu.memory_space<vmem>>, %arg2: memref<4x256xf32, #tpu.memory_space<vmem>>, %arg3: memref<8x256xf32, #tpu.memory_space<vmem>>) attributes {dimension_semantics = [#tpu.dimension_semantics<parallel>], iteration_bounds = array<i64: 1>, scalar_prefetch = 0 : i64, scratch_operands = 0 : i64, tpu.core_type = #tpu.core_type<tc>, window_params = [{transform_indices = @transform_0, window_bounds = array<i64: 8, 4, 256>}, {pipeline_mode = #tpu.pipeline_mode<synchronous>, transform_indices = @transform_1, window_bounds = array<i64: 4, 256>}, {transform_indices = @transform_2, window_bounds = array<i64: 8, 256>}]} {
    %c0 = arith.constant 0 : index
    %c0_0 = arith.constant 0 : index
    %c0_1 = arith.constant 0 : index
    %0 = vector.load %arg1[%c0, %c0_0, %c0_1] : memref<8x4x256xf32, #tpu.memory_space<vmem>>, vector<8x4x256xf32>
    %cst = arith.constant dense<0.000000e+00> : vector<8x256xf32>
    %1 = vector.multi_reduction <add>, %0, %cst [1] : vector<8x4x256xf32> to vector<8x256xf32>
    %cst_2 = arith.constant 2.500000e-01 : f32
    %2 = vector.broadcast %cst_2 : f32 to vector<8x256xf32>
    %3 = arith.mulf %1, %2 : vector<8x256xf32>
    %4 = vector.shape_cast %3 : vector<8x256xf32> to vector<8x1x256xf32>
    %c0_3 = arith.constant 0 : index
    %c0_4 = arith.constant 0 : index
    %5 = vector.load %arg2[%c0_3, %c0_4] : memref<4x256xf32, #tpu.memory_space<vmem>>, vector<4x256xf32>
    %6 = vector.shape_cast %5 : vector<4x256xf32> to vector<1x4x256xf32>
    %7 = vector.broadcast %4 : vector<8x1x256xf32> to vector<8x4x256xf32>
    %8 = vector.broadcast %6 : vector<1x4x256xf32> to vector<8x4x256xf32>
    %9 = arith.mulf %7, %8 : vector<8x4x256xf32>
    %cst_5 = arith.constant dense<0x7F800000> : vector<8x4xf32>
    %10 = vector.multi_reduction <minimumf>, %9, %cst_5 [2] : vector<8x4x256xf32> to vector<8x4xf32>
    %11 = vector.shape_cast %10 : vector<8x4xf32> to vector<8x4x1xf32>
    %cst_6 = arith.constant dense<0xFF800000> : vector<8x4xf32>
    %12 = vector.multi_reduction <maximumf>, %9, %cst_6 [2] : vector<8x4x256xf32> to vector<8x4xf32>
    %13 = vector.shape_cast %12 : vector<8x4xf32> to vector<8x4x1xf32>
    %14 = arith.subf %13, %11 : vector<8x4x1xf32>
    %cst_7 = arith.constant 1.000000e-30 : f32
    %15 = vector.broadcast %cst_7 : f32 to vector<8x4x1xf32>
    %16 = arith.maximumf %14, %15 : vector<8x4x1xf32>
    %17 = tpu.reciprocal %16 {approx = true} : vector<8x4x1xf32> -> vector<8x4x1xf32>
    %18 = vector.broadcast %11 : vector<8x4x1xf32> to vector<8x4x256xf32>
    %19 = arith.subf %9, %18 : vector<8x4x256xf32>
    %20 = vector.broadcast %17 : vector<8x4x1xf32> to vector<8x4x256xf32>
    %21 = arith.mulf %19, %20 : vector<8x4x256xf32>
    %cst_8 = arith.constant dense<0.000000e+00> : vector<8x256xf32>
    %22 = vector.multi_reduction <add>, %21, %cst_8 [1] : vector<8x4x256xf32> to vector<8x256xf32>
    %cst_9 = arith.constant 2.500000e-01 : f32
    %23 = vector.broadcast %cst_9 : f32 to vector<8x256xf32>
    %24 = arith.mulf %22, %23 : vector<8x256xf32>
    %c0_10 = arith.constant 0 : index
    %c0_11 = arith.constant 0 : index
    %25 = vector.load %arg3[%c0_10, %c0_11] : memref<8x256xf32, #tpu.memory_space<vmem>>, vector<8x256xf32>
    tpu.vector_store %arg3[%c0_10, %c0_11], %24 {strides = array<i32>} : memref<8x256xf32, #tpu.memory_space<vmem>>, vector<8x256xf32>,
    return
  }
  func.func @transform_0(%arg0: i32) -> (i32, i32, i32) {
    %c0_i32 = arith.constant 0 : i32
    %c0_i32_0 = arith.constant 0 : i32
    %c0_i32_1 = arith.constant 0 : i32
    return %arg0, %c0_i32, %c0_i32_0 : i32, i32, i32
  }
  func.func @transform_1(%arg0: i32) -> (i32, i32) {
    %c0_i32 = arith.constant 0 : i32
    %c0_i32_0 = arith.constant 0 : i32
    %c0_i32_1 = arith.constant 0 : i32
    return %c0_i32, %c0_i32_0 : i32, i32
  }
  func.func @transform_2(%arg0: i32) -> (i32, i32) {
    %c0_i32 = arith.constant 0 : i32
    %c0_i32_0 = arith.constant 0 : i32
    return %arg0, %c0_i32 : i32, i32
  }
}

</mosaic_0001>

<bundles_post_ra>
// kernel: tpu_custom_call.1
= control target key start
LH: loop header
LB: loop body
LE: loop exit
PB: predicated region body
PF: predicated region fallthrough
CT: control target
= control target key end

     0   :  { %7 = vsyncpa [#allocation3], 0  ;;  %s900_s0 = inlined_call_operand.hbm [shape: f32[8,4,256], index: 0, kind: input, shape index: {}]   ;;  %s901_s1 = inlined_call_operand.hbm [shape: f32[4,256], index: 1, kind: input, shape index: {}]   ;;  %s902_s2 = inlined_call_operand.hbm [shape: f32[8,256], index: 2, kind: output, shape index: {}]  }
   0x1   :  { %8 = vsyncpa [#allocation6], 0 }
   0x2   :  { %9 = vsyncpa [#allocation4], 0  ;;  %s642_s9 = smov [#allocation2]   ;;  %s570_s13 = scalar_lea.hbm %s900_s0, 1024 }
   0x3   :  { %s15_s10 = sshll.u32 %s642_s9, 4  ;;  %p571_p0 = scmp.ne.s32.totalorder %s900_s0, %s570_s13  ;;  %s16_s10 = int_to_ptr.vmem [resolvable:$true] %s15_s10 }
   0x4   :  { %p574_p1 = scmp.lt.u32.totalorder %s570_s13, %s900_s0 }
   0x6   :  { %p576_p2 = pnand %p574_p1, %p571_p0 }
   0x8   :  { %579 = shalt.err (!%p576_p2)
}
   0x9   :  { %s580_s18 = scalar_lea.vmem %s16_s10, 1024  ;;  %p585_p4 = scmp.lt.s32.totalorder %s16_s10, %s16_s10 }
   0xa   :  { %p581_p3 = scmp.ne.s32.totalorder %s16_s10, %s580_s18  ;;  %p586_p5 = scmp.lt.s32.totalorder %s580_s18, %s580_s18 }
   0xc   :  { %p587_p6 = por %p586_p5, %p585_p4 }
   0xe   :  { %p588_p7 = pnand %p587_p6, %p581_p3 }
  0x10   :  { %591 = shalt.err (!%p588_p7)
}
  0x11   :  { %s643_s19 = smov 128   ;;  %s644_s20 = smov 8  }
  0x12   :  { %21 = dma.hbm_to_vmem [thread:$0]  %s900_s0, 1024, %s16_s10, [#allocation3], %s643_s19, %s643_s19, %s644_s20  }
  0x13   :  { %s645_s23 = smov [#allocation5]   ;;  %s592_s27 = scalar_lea.hbm %s901_s1, 128 }
  0x14   :  { %s28_s24 = sshll.u32 %s645_s23, 4  ;;  %p593_p8 = scmp.ne.s32.totalorder %s901_s1, %s592_s27  ;;  %s29_s24 = int_to_ptr.vmem [resolvable:$true] %s28_s24 }
  0x15   :  { %p596_p9 = scmp.lt.u32.totalorder %s592_s27, %s901_s1 }
  0x17   :  { %p598_p10 = pnand %p596_p9, %p593_p8 }
  0x19   :  { %601 = shalt.err (!%p598_p10)
}
  0x1a   :  { %s602_s4 = scalar_lea.vmem %s29_s24, 128  ;;  %p607_p12 = scmp.lt.s32.totalorder %s29_s24, %s29_s24 }
  0x1b   :  { %p603_p11 = scmp.ne.s32.totalorder %s29_s24, %s602_s4  ;;  %p608_p13 = scmp.lt.s32.totalorder %s602_s4, %s602_s4 }
  0x1d   :  { %p609_p0 = por %p608_p13, %p607_p12 }
  0x1f   :  { %p610_p1 = pnand %p609_p0, %p603_p11 }
  0x21   :  { %613 = shalt.err (!%p610_p1)
}
  0x22   :  { %31 = dma.hbm_to_vmem [thread:$0]  %s901_s1, 128, %s29_s24, [#allocation6]  }
  0x23   :  { %636 = dma.done.wait [#allocation3], 1024  }
  0x24   :  { %637 = vsyncadd [#allocation3], 4294966272 }
  0x25   :  { %638 = dma.done.wait [#allocation6], 128  }
  0x26   :  { %639 = vsyncadd [#allocation6], 4294967168  ;;  %vm70_vm0 = vcmask 1043456   ;;  %v38_v0 = vld [vmem:[#allocation2] sm:$0xff]  ;;  %v39_v2 = vld [vmem:[#allocation2 + $0x8] sm:$0xff]  ;;  %vm499_vm1 = vcmask 1041409  }
  0x27   :  { %v686_v1 = vld [vmem:[#allocation5] sm:$0xff]  ;;  %v54_v3 = vcombine.high %v38_v0, %v38_v0  ;;  %v71_v4 = vsel %vm70_vm0, %v38_v0, 0.0  ;;  %v55_v6 = vcombine.high %v39_v2, %v39_v2  ;;  %v40_v7 = vld [vmem:[#allocation2 + $0x10] sm:$0xff]  ;;  %v85_v9 = vsel %vm70_vm0, %v39_v2, 0.0  ;;  %v41_v12 = vld [vmem:[#allocation2 + $0x18] sm:$0xff]  ;;  %s646_s1 = smov [#allocation7]  }
  0x28   :  { %v691_v5 = vcombine.high %v686_v1, %v686_v1  ;;  %v72_v8 = vrot.slane %v71_v4, 4  ;;  %v56_v10 = vcombine.high %v40_v7, %v40_v7  ;;  %v99_v11 = vsel %vm70_vm0, %v40_v7, 0.0  ;;  %s530_s6 = sshll.u32 %s646_s1, 4  ;;  %s531_s6 = int_to_ptr.vmem [resolvable:$true] %s530_s6 }
  0x29   :  { %v78_v13 = vsel %vm70_vm0, %v54_v3, 0.0  ;;  %v86_v14 = vrot.slane %v85_v9, 4  ;;  %v92_v15 = vsel %vm70_vm0, %v55_v6, 0.0  ;;  %v100_v16 = vrot.slane %v99_v11, 4  ;;  %s614_s7 = scalar_lea.vmem %s531_s6, 256  ;;  %p619_p3 = scmp.lt.s32.totalorder %s531_s6, %s531_s6 }
  0x2a   :  { %v73_v17 = vadd.f32 %v72_v8, %v71_v4  ;;  %v79_v18 = vrot.slane %v78_v13, 4  ;;  %v93_v19 = vrot.slane %v92_v15, 4  ;;  %v106_v20 = vsel %vm70_vm0, %v56_v10, 0.0  ;;  %p615_p2 = scmp.ne.s32.totalorder %s531_s6, %s614_s7  ;;  %p620_p4 = scmp.lt.s32.totalorder %s614_s7, %s614_s7 }
  0x2b   :  { %v87_v21 = vadd.f32 %v86_v14, %v85_v9  ;;  %v101_v22 = vadd.f32 %v100_v16, %v99_v11  ;;  %v107_v23 = vrot.slane %v106_v20, 4  ;;  %v57_v24 = vcombine.high %v41_v12, %v41_v12 }
  0x2c   :  { %v74_v25 = vrot.slane %v73_v17, 2  ;;  %v80_v26 = vadd.f32 %v79_v18, %v78_v13  ;;  %v94_v27 = vadd.f32 %v93_v19, %v92_v15  ;;  %v113_v28 = vsel %vm70_vm0, %v41_v12, 0.0  ;;  %p621_p5 = por %p620_p4, %p619_p3 }
  0x2d   :  { %v88_v29 = vrot.slane %v87_v21, 2  ;;  %v102_v30 = vrot.slane %v101_v22, 2  ;;  %v108_v31 = vadd.f32 %v107_v23, %v106_v20  ;;  %v114_v32 = vrot.slane %v113_v28, 4  ;;  %v42_v23 = vld [vmem:[#allocation2 + $0x20] sm:$0xff] }
  0x2e   :  { %v75_v33 = vadd.f32 %v74_v25, %v73_v17  ;;  %v81_v34 = vrot.slane %v80_v26, 2  ;;  %v95_v35 = vrot.slane %v94_v27, 2  ;;  %v120_v36 = vsel %vm70_vm0, %v57_v24, 0.0  ;;  %p622_p6 = pnand %p621_p5, %p615_p2 }
  0x2f   :  { %v89_v37 = vadd.f32 %v88_v29, %v87_v21  ;;  %v103_v38 = vadd.f32 %v102_v30, %v101_v22  ;;  %v109_v39 = vrot.slane %v108_v31, 2  ;;  %v115_v40 = vadd.f32 %v114_v32, %v113_v28  ;;  %v43_v28 = vld [vmem:[#allocation2 + $0x28] sm:$0xff] }
  0x30   :  { %v76_v41 = vrot.slane %v75_v33, 1  ;;  %v82_v42 = vadd.f32 %v81_v34, %v80_v26  ;;  %v96_v43 = vadd.f32 %v95_v35, %v94_v27  ;;  %v121_v44 = vrot.slane %v120_v36, 4 }
  0x31   :  { %v90_v45 = vrot.slane %v89_v37, 1  ;;  %v104_v46 = vrot.slane %v103_v38, 1  ;;  %v110_v47 = vadd.f32 %v109_v39, %v108_v31  ;;  %v116_v48 = vrot.slane %v115_v40, 2 }
  0x32   :  { %v77_v49 = vadd.f32 %v76_v41, %v75_v33  ;;  %v83_v50 = vrot.slane %v82_v42, 1  ;;  %v97_v51 = vrot.slane %v96_v43, 1  ;;  %v122_v52 = vadd.f32 %v121_v44, %v120_v36 }
  0x33   :  { %v91_v53 = vadd.f32 %v90_v45, %v89_v37  ;;  %v105_v54 = vadd.f32 %v104_v46, %v103_v38  ;;  %v111_v55 = vrot.slane %v110_v47, 1  ;;  %v117_v56 = vadd.f32 %v116_v48, %v115_v40  ;;  %v44_v37 = vld [vmem:[#allocation2 + $0x30] sm:$0xff] }
  0x34   :  { %v84_v57 = vadd.f32 %v83_v50, %v82_v42  ;;  %v183_v58 = vmul.f32 0.25, %v77_v49  ;;  %v98_v59 = vadd.f32 %v97_v51, %v96_v43  ;;  %v123_v60 = vrot.slane %v122_v52, 2 }
  0x35   :  { %v185_v61 = vmul.f32 0.25, %v91_v53  ;;  %v112_v62 = vadd.f32 %v111_v55, %v110_v47  ;;  %v187_v63 = vmul.f32 0.25, %v105_v54  ;;  %v118_v0 = vrot.slane %v117_v56, 1 }
  0x36   :  { %v184_v2 = vmul.f32 0.25, %v84_v57  ;;  %v701_v3 = vmul.f32 %v686_v1, %v183_v58  ;;  %v186_v4 = vmul.f32 0.25, %v98_v59  ;;  %v124_v6 = vadd.f32 %v123_v60, %v122_v52 }
  0x37   :  { %v704_v7 = vmul.f32 %v686_v1, %v185_v61  ;;  %v188_v8 = vmul.f32 0.25, %v112_v62  ;;  %v707_v9 = vmul.f32 %v686_v1, %v187_v63  ;;  %v119_v10 = vadd.f32 %v118_v0, %v117_v56 }
  0x38   :  { %v710_v11 = vmul.f32 %v691_v5, %v184_v2  ;;  %v259_v12 = vsel %vm70_vm0, %v701_v3, -inf  ;;  %v219_v13 = vsel %vm70_vm0, %v701_v3, inf  ;;  %v717_v14 = vmul.f32 %v691_v5, %v186_v4  ;;  %v45_v4 = vld [vmem:[#allocation2 + $0x38] sm:$0xff] }
  0x39   :  { %v264_v15 = vsel %vm70_vm0, %v704_v7, -inf  ;;  %v224_v16 = vsel %vm70_vm0, %v704_v7, inf  ;;  %v724_v17 = vmul.f32 %v691_v5, %v188_v8  ;;  %v269_v18 = vsel %vm70_vm0, %v707_v9, -inf }
  0x3a   :  { %v260_v19 = vsel %vm70_vm0, %v710_v11, -inf  ;;  %v220_v20 = vsel %vm70_vm0, %v710_v11, inf  ;;  %v265_v21 = vsel %vm70_vm0, %v717_v14, -inf  ;;  %v225_v22 = vsel %vm70_vm0, %v717_v14, inf }
  0x3b   :  { %v261_v24 = vmax.f32 %v259_v12, %v260_v19  ;;  %v221_v25 = vmin.f32 %v219_v13, %v220_v20  ;;  %v266_v26 = vmax.f32 %v264_v15, %v265_v21  ;;  %v226_v27 = vmin.f32 %v224_v16, %v225_v22 }
  0x3c   :  { %v270_v29 = vsel %vm70_vm0, %v724_v17, -inf  ;;  %v229_v30 = vsel %vm70_vm0, %v707_v9, inf  ;;  %v230_v31 = vsel %vm70_vm0, %v724_v17, inf  ;;  %v125_v32 = vrot.slane %v124_v6, 1 }
  0x3d   :  { %262 = vmax.xlane.f32.xlu1 %v261_v24  ;;  %222 = vmin.xlane.f32.xlu0 %v221_v25  ;;  %v271_v33 = vmax.f32 %v269_v18, %v270_v29  ;;  %v231_v34 = vmin.f32 %v229_v30, %v230_v31  ;;  %v189_v35 = vmul.f32 0.25, %v119_v10  ;;  %v58_v36 = vcombine.high %v42_v23, %v42_v23 }
  0x3e   :  { %v126_v38 = vadd.f32 %v125_v32, %v124_v6  ;;  %v127_v39 = vsel %vm70_vm0, %v42_v23, 0.0  ;;  %v59_v40 = vcombine.high %v43_v28, %v43_v28  ;;  %v141_v41 = vsel %vm70_vm0, %v43_v28, 0.0 }
  0x3f   :  { %v745_v42 = vmul.f32 %v686_v1, %v189_v35  ;;  %v128_v43 = vrot.slane %v127_v39, 4  ;;  %v134_v44 = vsel %vm70_vm0, %v58_v36, 0.0  ;;  %v142_v45 = vrot.slane %v141_v41, 4 }
  0x40   :  { %v190_v46 = vmul.f32 0.25, %v126_v38  ;;  %v135_v47 = vrot.slane %v134_v44, 4  ;;  %v148_v48 = vsel %vm70_vm0, %v59_v40, 0.0  ;;  %v60_v49 = vcombine.high %v44_v37, %v44_v37 }
  0x41   :  { %267 = vmax.xlane.f32.xlu1 %v266_v26  ;;  %227 = vmin.xlane.f32.xlu0 %v226_v27  ;;  %v274_v50 = vsel %vm70_vm0, %v745_v42, -inf  ;;  %v234_v51 = vsel %vm70_vm0, %v745_v42, inf  ;;  %v129_v52 = vadd.f32 %v128_v43, %v127_v39  ;;  %v143_v53 = vadd.f32 %v142_v45, %v141_v41 }
  0x42   :  { %v754_v54 = vmul.f32 %v691_v5, %v190_v46  ;;  %v136_v55 = vadd.f32 %v135_v47, %v134_v44  ;;  %v149_v56 = vrot.slane %v148_v48, 4  ;;  %v155_v57 = vsel %vm70_vm0, %v44_v37, 0.0 }
  0x43   :  { %v130_v58 = vrot.slane %v129_v52, 2  ;;  %v144_v59 = vrot.slane %v143_v53, 2  ;;  %v156_v60 = vrot.slane %v155_v57, 4  ;;  %v162_v61 = vsel %vm70_vm0, %v60_v49, 0.0 }
  0x44   :  { %v275_v62 = vsel %vm70_vm0, %v754_v54, -inf  ;;  %v235_v63 = vsel %vm70_vm0, %v754_v54, inf  ;;  %v137_v0 = vrot.slane %v136_v55, 2  ;;  %v150_v2 = vadd.f32 %v149_v56, %v148_v48 }
  0x45   :  { %272 = vmax.xlane.f32.xlu1 %v271_v33  ;;  %232 = vmin.xlane.f32.xlu0 %v231_v34  ;;  %v276_v6 = vmax.f32 %v274_v50, %v275_v62  ;;  %v236_v8 = vmin.f32 %v234_v51, %v235_v63  ;;  %v131_v10 = vadd.f32 %v130_v58, %v129_v52  ;;  %v163_v12 = vrot.slane %v162_v61, 4 }
  0x46   :  { %v138_v13 = vadd.f32 %v137_v0, %v136_v55  ;;  %v145_v15 = vadd.f32 %v144_v59, %v143_v53  ;;  %v151_v16 = vrot.slane %v150_v2, 2  ;;  %v157_v18 = vadd.f32 %v156_v60, %v155_v57 }
  0x47   :  { %v132_v19 = vrot.slane %v131_v10, 1  ;;  %v164_v20 = vadd.f32 %v163_v12, %v162_v61  ;;  %v61_v21 = vcombine.high %v45_v4, %v45_v4  ;;  %v169_v22 = vsel %vm70_vm0, %v45_v4, 0.0 }
  0x48   :  { %v139_v23 = vrot.slane %v138_v13, 1  ;;  %v146_v24 = vrot.slane %v145_v15, 1  ;;  %v152_v25 = vadd.f32 %v151_v16, %v150_v2  ;;  %v158_v26 = vrot.slane %v157_v18, 2 }
  0x49   :  { %277 = vmax.xlane.f32.xlu1 %v276_v6  ;;  %237 = vmin.xlane.f32.xlu0 %v236_v8  ;;  %v133_v27 = vadd.f32 %v132_v19, %v131_v10  ;;  %v165_v28 = vrot.slane %v164_v20, 2  ;;  %v170_v29 = vrot.slane %v169_v22, 4  ;;  %v176_v30 = vsel %vm70_vm0, %v61_v21, 0.0 }
  0x4a   :  { %v140_v31 = vadd.f32 %v139_v23, %v138_v13  ;;  %v147_v32 = vadd.f32 %v146_v24, %v145_v15  ;;  %v153_v33 = vrot.slane %v152_v25, 1  ;;  %v159_v34 = vadd.f32 %v158_v26, %v157_v18 }
  0x4b   :  { %v191_v35 = vmul.f32 0.25, %v133_v27  ;;  %v166_v36 = vadd.f32 %v165_v28, %v164_v20  ;;  %v171_v37 = vadd.f32 %v170_v29, %v169_v22  ;;  %v177_v38 = vrot.slane %v176_v30, 4 }
  0x4c   :  { %v192_v39 = vmul.f32 0.25, %v140_v31  ;;  %v154_v40 = vadd.f32 %v153_v33, %v152_v25  ;;  %v193_v41 = vmul.f32 0.25, %v147_v32  ;;  %v160_v43 = vrot.slane %v159_v34, 1 }
  0x4d   :  { %v765_v44 = vmul.f32 %v686_v1, %v191_v35  ;;  %v167_v45 = vrot.slane %v166_v36, 1  ;;  %v172_v46 = vrot.slane %v171_v37, 2  ;;  %v178_v47 = vadd.f32 %v177_v38, %v176_v30 }
  0x4e   :  { %v768_v48 = vmul.f32 %v691_v5, %v192_v39  ;;  %v194_v49 = vmul.f32 0.25, %v154_v40  ;;  %v771_v50 = vmul.f32 %v686_v1, %v193_v41  ;;  %v161_v51 = vadd.f32 %v160_v43, %v159_v34 }
  0x4f   :  { %v279_v52 = vsel %vm70_vm0, %v765_v44, -inf  ;;  %v239_v53 = vsel %vm70_vm0, %v765_v44, inf  ;;  %v168_v55 = vadd.f32 %v167_v45, %v166_v36  ;;  %v173_v56 = vadd.f32 %v172_v46, %v171_v37 }
  0x50   :  { %v280_v57 = vsel %vm70_vm0, %v768_v48, -inf  ;;  %v240_v58 = vsel %vm70_vm0, %v768_v48, inf  ;;  %v782_v59 = vmul.f32 %v691_v5, %v194_v49  ;;  %v284_v60 = vsel %vm70_vm0, %v771_v50, -inf }
  0x51   :  { %v281_v61 = vmax.f32 %v279_v52, %v280_v57  ;;  %v241_v62 = vmin.f32 %v239_v53, %v240_v58  ;;  %v244_v63 = vsel %vm70_vm0, %v771_v50, inf  ;;  %v195_v0 = vmul.f32 0.25, %v161_v51 }
  0x52   :  { %v285_v2 = vsel %vm70_vm0, %v782_v59, -inf  ;;  %v245_v4 = vsel %vm70_vm0, %v782_v59, inf  ;;  %v196_v6 = vmul.f32 0.25, %v168_v55  ;;  %v174_v8 = vrot.slane %v173_v56, 1 }
  0x53   :  { %282 = vmax.xlane.f32.xlu1 %v281_v61  ;;  %242 = vmin.xlane.f32.xlu0 %v241_v62  ;;  %v286_v10 = vmax.f32 %v284_v60, %v285_v2  ;;  %v246_v12 = vmin.f32 %v244_v63, %v245_v4  ;;  %v793_v13 = vmul.f32 %v686_v1, %v195_v0  ;;  %v179_v15 = vrot.slane %v178_v47, 2 }
  0x54   :  { %v796_v16 = vmul.f32 %v691_v5, %v196_v6  ;;  %v175_v18 = vadd.f32 %v174_v8, %v173_v56  ;;  %vm501_vm2 = vcmask 1042434   ;;  %vm503_vm3 = vcmask 1043459  }
  0x55   :  { %v289_v19 = vsel %vm70_vm0, %v793_v13, -inf  ;;  %v249_v20 = vsel %vm70_vm0, %v793_v13, inf  ;;  %v180_v21 = vadd.f32 %v179_v15, %v178_v47  ;;  %vm505_vm4 = vcmask 1044484  }
  0x56   :  { %v290_v22 = vsel %vm70_vm0, %v796_v16, -inf  ;;  %v250_v23 = vsel %vm70_vm0, %v796_v16, inf  ;;  %v197_v24 = vmul.f32 0.25, %v175_v18  ;;  %vm507_vm5 = vcmask 1045509  }
  0x57   :  { %287 = vmax.xlane.f32.xlu1 %v286_v10  ;;  %247 = vmin.xlane.f32.xlu0 %v246_v12  ;;  %v291_v25 = vmax.f32 %v289_v19, %v290_v22  ;;  %v251_v26 = vmin.f32 %v249_v20, %v250_v23  ;;  %v181_v27 = vrot.slane %v180_v21, 1  ;;  %vm509_vm6 = vcmask 1046534  }
  0x58   :  { %v807_v29 = vmul.f32 %v686_v1, %v197_v24  ;;  %vm511_vm7 = vcmask 1047559  }
  0x59   :  { %v182_v28 = vadd.f32 %v181_v27, %v180_v21 }
  0x5a   :  { %v294_v32 = vsel %vm70_vm0, %v807_v29, -inf  ;;  %v254_v33 = vsel %vm70_vm0, %v807_v29, inf }
  0x5b   :  { %292 = vmax.xlane.f32.xlu1 %v291_v25  ;;  %252 = vmin.xlane.f32.xlu0 %v251_v26  ;;  %v198_v30 = vmul.f32 0.25, %v182_v28 }
  0x5d   :  { %v810_v31 = vmul.f32 %v691_v5, %v198_v30 }
  0x5f   :  { %v295_v34 = vsel %vm70_vm0, %v810_v31, -inf  ;;  %v255_v35 = vsel %vm70_vm0, %v810_v31, inf }
  0x60   :  { %v296_v1 = vmax.f32 %v294_v32, %v295_v34  ;;  %v256_v36 = vmin.f32 %v254_v33, %v255_v35 }
  0x62   :  { %297 = vmax.xlane.f32.xlu1 %v296_v1  ;;  %257 = vmin.xlane.f32.xlu0 %v256_v36 }
  0xca   :  { %v263_v37 = vpop.xlane.xlu1 %262  ;;  %v223_v38 = vpop.xlane.xlu0 %222 }
  0xcb   :  { %v299_v5 = vsub.f32 %v263_v37, %v223_v38  ;;  %v323_v56 = vsub.f32 %v701_v3, %v223_v38  ;;  %v324_v57 = vsub.f32 %v710_v11, %v223_v38 }
  0xcd   :  { %v307_v39 = vmax.f32 %v299_v5, 1e-30 }
  0xce   :  { %v268_v40 = vpop.xlane.xlu1 %267  ;;  %v228_v41 = vpop.xlane.xlu0 %227 }
  0xcf   :  { %554 = vrcp.f32 %v307_v39  ;;  %v300_v43 = vsub.f32 %v268_v40, %v228_v41  ;;  %v325_v63 = vsub.f32 %v704_v7, %v228_v41  ;;  %v326_v0 = vsub.f32 %v717_v14, %v228_v41 }
  0xd1   :  { %v308_v45 = vmax.f32 %v300_v43, 1e-30 }
  0xd2   :  { %v273_v46 = vpop.xlane.xlu1 %272  ;;  %v233_v47 = vpop.xlane.xlu0 %232 }
  0xd3   :  { %556 = vrcp.f32 %v308_v45  ;;  %v301_v49 = vsub.f32 %v273_v46, %v233_v47  ;;  %v327_v15 = vsub.f32 %v707_v9, %v233_v47  ;;  %v328_v22 = vsub.f32 %v724_v17, %v233_v47 }
  0xd5   :  { %v309_v51 = vmax.f32 %v301_v49, 1e-30 }
  0xd6   :  { %v278_v52 = vpop.xlane.xlu1 %277  ;;  %v238_v53 = vpop.xlane.xlu0 %237 }
  0xd7   :  { %558 = vrcp.f32 %v309_v51  ;;  %v302_v55 = vsub.f32 %v278_v52, %v238_v53  ;;  %v329_v38 = vsub.f32 %v745_v42, %v238_v53  ;;  %v330_v5 = vsub.f32 %v754_v54, %v238_v53 }
  0xd9   :  { %v555_v58 = vpop.eup %554  ;;  %v310_v60 = vmax.f32 %v302_v55, 1e-30 }
  0xda   :  { %v339_v61 = vmul.f32 %v555_v58, %v323_v56  ;;  %v340_v62 = vmul.f32 %v555_v58, %v324_v57 }
  0xdb   :  { %560 = vrcp.f32 %v310_v60 }
  0xdc   :  { %v355_v4 = vsel %vm70_vm0, %v339_v61, 0.0  ;;  %v362_v6 = vsel %vm70_vm0, %v340_v62, 0.0 }
  0xdd   :  { %v557_v2 = vpop.eup %556  ;;  %v356_v12 = vrot.slane %v355_v4, 4  ;;  %v363_v14 = vrot.slane %v362_v6, 4 }
  0xde   :  { %v341_v8 = vmul.f32 %v557_v2, %v325_v63  ;;  %v342_v10 = vmul.f32 %v557_v2, %v326_v0 }
  0xdf   :  { %v357_v28 = vadd.f32 %v356_v12, %v355_v4  ;;  %v364_v9 = vadd.f32 %v363_v14, %v362_v6 }
  0xe0   :  { %v369_v3 = vsel %vm70_vm0, %v341_v8, 0.0  ;;  %v376_v11 = vsel %vm70_vm0, %v342_v10, 0.0  ;;  %v283_v18 = vpop.xlane.xlu1 %282  ;;  %v829_v19 = vpop.xlane.xlu0 %242 }
  0xe1   :  { %v559_v7 = vpop.eup %558  ;;  %v370_v20 = vrot.slane %v369_v3, 4  ;;  %v377_v21 = vrot.slane %v376_v11, 4  ;;  %v303_v27 = vsub.f32 %v283_v18, %v829_v19  ;;  %v358_v17 = vrot.slane %v357_v28, 2 }
  0xe2   :  { %v343_v23 = vmul.f32 %v559_v7, %v327_v15  ;;  %v344_v26 = vmul.f32 %v559_v7, %v328_v22  ;;  %v365_v39 = vrot.slane %v364_v9, 2  ;;  %v331_v14 = vsub.f32 %v765_v44, %v829_v19 }
  0xe3   :  { %v371_v24 = vadd.f32 %v370_v20, %v369_v3  ;;  %v378_v25 = vadd.f32 %v377_v21, %v376_v11  ;;  %v311_v37 = vmax.f32 %v303_v27, 1e-30  ;;  %v359_v55 = vadd.f32 %v358_v17, %v357_v28 }
  0xe4   :  { %v288_v30 = vpop.xlane.xlu1 %287  ;;  %v833_v32 = vpop.xlane.xlu0 %247  ;;  %v383_v33 = vsel %vm70_vm0, %v343_v23, 0.0  ;;  %v390_v36 = vsel %vm70_vm0, %v344_v26, 0.0  ;;  %v366_v56 = vadd.f32 %v365_v39, %v364_v9  ;;  %v332_v20 = vsub.f32 %v768_v48, %v829_v19 }
  0xe5   :  { %v561_v34 = vpop.eup %560  ;;  %v372_v35 = vrot.slane %v371_v24, 2  ;;  %v379_v1 = vrot.slane %v378_v25, 2  ;;  %v384_v40 = vrot.slane %v383_v33, 4  ;;  %v391_v45 = vrot.slane %v390_v36, 4 }
  0xe6   :  { %v345_v46 = vmul.f32 %v561_v34, %v329_v38  ;;  %v346_v47 = vmul.f32 %v561_v34, %v330_v5  ;;  %562 = vrcp.f32 %v311_v37  ;;  %v304_v52 = vsub.f32 %v288_v30, %v833_v32 }
  0xe7   :  { %v373_v49 = vadd.f32 %v372_v35, %v371_v24  ;;  %v380_v51 = vadd.f32 %v379_v1, %v378_v25  ;;  %v385_v57 = vadd.f32 %v384_v40, %v383_v33  ;;  %v392_v42 = vadd.f32 %v391_v45, %v390_v36 }
  0xe8   :  { %v293_v41 = vpop.xlane.xlu1 %292  ;;  %v839_v43 = vpop.xlane.xlu0 %252  ;;  %v312_v58 = vmax.f32 %v304_v52, 1e-30  ;;  %v397_v54 = vsel %vm70_vm0, %v345_v46, 0.0  ;;  %v404_v61 = vsel %vm70_vm0, %v346_v47, 0.0  ;;  %v360_v0 = vrot.slane %v359_v55, 1 }
  0xe9   :  { %v374_v53 = vrot.slane %v373_v49, 1  ;;  %v381_v60 = vrot.slane %v380_v51, 1  ;;  %v367_v2 = vrot.slane %v366_v56, 1  ;;  %v386_v4 = vrot.slane %v385_v57, 2 }
  0xea   :  { %564 = vrcp.f32 %v312_v58  ;;  %v305_v6 = vsub.f32 %v293_v41, %v839_v43  ;;  %v393_v10 = vrot.slane %v392_v42, 2  ;;  %v398_v12 = vrot.slane %v397_v54, 4 }
  0xeb   :  { %v405_v3 = vrot.slane %v404_v61, 4  ;;  %v375_v11 = vadd.f32 %v374_v53, %v373_v49  ;;  %v382_v15 = vadd.f32 %v381_v60, %v380_v51  ;;  %v361_v22 = vadd.f32 %v360_v0, %v359_v55 }
  0xec   :  { %v313_v18 = vmax.f32 %v305_v6, 1e-30  ;;  %v368_v23 = vadd.f32 %v367_v2, %v366_v56  ;;  %v387_v24 = vadd.f32 %v386_v4, %v385_v57  ;;  %v394_v25 = vadd.f32 %v393_v10, %v392_v42 }
  0xed   :  { %v399_v26 = vadd.f32 %v398_v12, %v397_v54  ;;  %v469_v30 = vmul.f32 0.25, %v375_v11  ;;  %v470_v9 = vmul.f32 0.25, %v382_v15  ;;  %v406_v33 = vadd.f32 %v405_v3, %v404_v61 }
  0xee   :  { %566 = vrcp.f32 %v313_v18  ;;  %v333_v48 = vsub.f32 %v771_v50, %v833_v32  ;;  %v334_v19 = vsub.f32 %v782_v59, %v833_v32  ;;  %v467_v1 = vmul.f32 0.25, %v361_v22 }
  0xef   :  { %v298_v62 = vpop.xlane.xlu1 %297  ;;  %v844_v63 = vpop.xlane.xlu0 %257  ;;  %v468_v36 = vmul.f32 0.25, %v368_v23  ;;  %v388_v38 = vrot.slane %v387_v24, 1  ;;  %v395_v5 = vrot.slane %v394_v25, 1  ;;  %v400_v41 = vrot.slane %v399_v26, 2 }
  0xf0   :  { %v306_v8 = vsub.f32 %v298_v62, %v844_v63  ;;  %v563_v21 = vpop.eup %562  ;;  %v407_v45 = vrot.slane %v406_v33, 2  ;;  %v859_v49 = vsel %vm499_vm1, %v469_v30, %v467_v1  ;;  %v335_v42 = vsub.f32 %v793_v13, %v839_v43 }
  0xf1   :  { %v347_v27 = vmul.f32 %v563_v21, %v331_v14  ;;  %v348_v28 = vmul.f32 %v563_v21, %v332_v20  ;;  %v862_v50 = vsel %vm499_vm1, %v470_v9, %v468_v36  ;;  %v389_v57 = vadd.f32 %v388_v38, %v387_v24 }
  0xf2   :  { %v314_v7 = vmax.f32 %v306_v8, 1e-30  ;;  %v396_v58 = vadd.f32 %v395_v5, %v394_v25  ;;  %v336_v54 = vsub.f32 %v796_v16, %v839_v43  ;;  %v401_v60 = vadd.f32 %v400_v41, %v399_v26 }
  0xf3   :  { %v411_v34 = vsel %vm70_vm0, %v347_v27, 0.0  ;;  %v418_v44 = vsel %vm70_vm0, %v348_v28, 0.0  ;;  %v408_v61 = vadd.f32 %v407_v45, %v406_v33  ;;  %v337_v6 = vsub.f32 %v807_v29, %v844_v63 }
  0xf4   :  { %568 = vrcp.f32 %v314_v7  ;;  %v565_v35 = vpop.eup %564  ;;  %v412_v37 = vrot.slane %v411_v34, 4  ;;  %v419_v17 = vrot.slane %v418_v44, 4  ;;  %v338_v8 = vsub.f32 %v810_v31, %v844_v63 }
  0xf5   :  { %v349_v39 = vmul.f32 %v565_v35, %v333_v48  ;;  %v350_v40 = vmul.f32 %v565_v35, %v334_v19  ;;  %v402_v7 = vrot.slane %v401_v60, 1  ;;  %v409_v14 = vrot.slane %v408_v61, 1 }
  0xf6   :  { %v413_v46 = vadd.f32 %v412_v37, %v411_v34  ;;  %v420_v47 = vadd.f32 %v419_v17, %v418_v44  ;;  %v471_v33 = vmul.f32 0.25, %v389_v57  ;;  %v472_v34 = vmul.f32 0.25, %v396_v58 }
  0xf7   :  { %v425_v59 = vsel %vm70_vm0, %v349_v39, 0.0  ;;  %v432_v32 = vsel %vm70_vm0, %v350_v40, 0.0  ;;  %v403_v44 = vadd.f32 %v402_v7, %v401_v60  ;;  %v410_v48 = vadd.f32 %v409_v14, %v408_v61 }
  0xf8   :  { %v414_v51 = vrot.slane %v413_v46, 2  ;;  %v421_v52 = vrot.slane %v420_v47, 2  ;;  %v426_v55 = vrot.slane %v425_v59, 4  ;;  %v433_v56 = vrot.slane %v432_v32, 4  ;;  %v567_v53 = vpop.eup %566 }
  0xf9   :  { %v351_v2 = vmul.f32 %v567_v53, %v335_v42  ;;  %v352_v4 = vmul.f32 %v567_v53, %v336_v54 }
  0xfa   :  { %v427_v62 = vadd.f32 %v426_v55, %v425_v59  ;;  %v434_v0 = vadd.f32 %v433_v56, %v432_v32  ;;  %v415_v12 = vadd.f32 %v414_v51, %v413_v46  ;;  %v422_v13 = vadd.f32 %v421_v52, %v420_v47 }
  0xfb   :  { %v439_v16 = vsel %vm70_vm0, %v351_v2, 0.0  ;;  %v446_v43 = vsel %vm70_vm0, %v352_v4, 0.0  ;;  %v473_v46 = vmul.f32 0.25, %v403_v44  ;;  %v474_v47 = vmul.f32 0.25, %v410_v48 }
  0xfc   :  { %v428_v3 = vrot.slane %v427_v62, 2  ;;  %v435_v11 = vrot.slane %v434_v0, 2  ;;  %v440_v29 = vrot.slane %v439_v16, 4  ;;  %v447_v22 = vrot.slane %v446_v43, 4 }
  0xfd   :  { %v416_v23 = vrot.slane %v415_v12, 1  ;;  %v423_v24 = vrot.slane %v422_v13, 1  ;;  %v502_v59 = vsel %vm501_vm2, %v471_v33, %v859_v49  ;;  %v514_v32 = vsel %vm501_vm2, %v472_v34, %v862_v50 }
  0xfe   :  { %v569_v10 = vpop.eup %568  ;;  %v429_v20 = vadd.f32 %v428_v3, %v427_v62  ;;  %v436_v21 = vadd.f32 %v435_v11, %v434_v0  ;;  %v441_v27 = vadd.f32 %v440_v29, %v439_v16  ;;  %v448_v28 = vadd.f32 %v447_v22, %v446_v43 }
  0xff   :  { %v353_v15 = vmul.f32 %v569_v10, %v337_v6  ;;  %v354_v18 = vmul.f32 %v569_v10, %v338_v8  ;;  %v417_v37 = vadd.f32 %v416_v23, %v415_v12  ;;  %v424_v17 = vadd.f32 %v423_v24, %v422_v13 }
 0x100   :  { %v430_v25 = vrot.slane %v429_v20, 1  ;;  %v437_v26 = vrot.slane %v436_v21, 1  ;;  %v442_v19 = vrot.slane %v441_v27, 2  ;;  %v449_v35 = vrot.slane %v448_v28, 2 }
 0x101   :  { %v453_v31 = vsel %vm70_vm0, %v353_v15, 0.0  ;;  %v460_v63 = vsel %vm70_vm0, %v354_v18, 0.0  ;;  %v475_v57 = vmul.f32 0.25, %v417_v37  ;;  %v476_v58 = vmul.f32 0.25, %v424_v17 }
 0x102   :  { %v454_v30 = vrot.slane %v453_v31, 4  ;;  %v461_v9 = vrot.slane %v460_v63, 4  ;;  %v431_v38 = vadd.f32 %v430_v25, %v429_v20  ;;  %v438_v5 = vadd.f32 %v437_v26, %v436_v21 }
 0x103   :  { %v443_v39 = vadd.f32 %v442_v19, %v441_v27  ;;  %v450_v40 = vadd.f32 %v449_v35, %v448_v28  ;;  %v504_v0 = vsel %vm503_vm3, %v473_v46, %v502_v59  ;;  %v515_v49 = vsel %vm503_vm3, %v474_v47, %v514_v32 }
 0x104   :  { %v455_v1 = vadd.f32 %v454_v30, %v453_v31  ;;  %v462_v36 = vadd.f32 %v461_v9, %v460_v63  ;;  %v477_v42 = vmul.f32 0.25, %v431_v38  ;;  %v478_v54 = vmul.f32 0.25, %v438_v5 }
 0x105   :  { %v444_v51 = vrot.slane %v443_v39, 1  ;;  %v451_v52 = vrot.slane %v450_v40, 1  ;;  %v506_v8 = vsel %vm505_vm4, %v475_v57, %v504_v0  ;;  %v516_v10 = vsel %vm505_vm4, %v476_v58, %v515_v49 }
 0x106   :  { %v456_v41 = vrot.slane %v455_v1, 2  ;;  %v463_v45 = vrot.slane %v462_v36, 2  ;;  %v508_v3 = vsel %vm507_vm5, %v477_v42, %v506_v8  ;;  %v517_v11 = vsel %vm507_vm5, %v478_v54, %v516_v10 }
 0x107   :  { %v445_v61 = vadd.f32 %v444_v51, %v443_v39  ;;  %v452_v62 = vadd.f32 %v451_v52, %v450_v40 }
 0x108   :  { %v457_v55 = vadd.f32 %v456_v41, %v455_v1  ;;  %v464_v56 = vadd.f32 %v463_v45, %v462_v36 }
 0x109   :  { %v479_v4 = vmul.f32 0.25, %v445_v61  ;;  %v480_v6 = vmul.f32 0.25, %v452_v62 }
 0x10a   :  { %v458_v53 = vrot.slane %v457_v55, 1  ;;  %v465_v60 = vrot.slane %v464_v56, 1 }
 0x10b   :  { %v510_v16 = vsel %vm509_vm6, %v479_v4, %v508_v3  ;;  %v518_v43 = vsel %vm509_vm6, %v480_v6, %v517_v11 }
 0x10c   :  { %v459_v2 = vadd.f32 %v458_v53, %v457_v55  ;;  %v466_v50 = vadd.f32 %v465_v60, %v464_v56 }
 0x10e   :  { %v481_v12 = vmul.f32 0.25, %v459_v2  ;;  %v482_v13 = vmul.f32 0.25, %v466_v50 }
 0x110   :  { %v512_v15 = vsel %vm511_vm7, %v481_v12, %v510_v16  ;;  %v519_v18 = vsel %vm511_vm7, %v482_v13, %v518_v43 }
 0x111   :  { %522 = vst [vmem:[#allocation7] sm:$0xff] %v512_v15  ;;  %523 = vst [vmem:[#allocation7 + $0x8] sm:$0xff] %v519_v18 }
 0x112   :  { %625 = shalt.err (!%p622_p6)
}
 0x113   :  { %s626_s10 = scalar_lea.hbm %s902_s2, 256 }
 0x114   :  { %p627_p7 = scmp.ne.s32.totalorder %s902_s2, %s626_s10  ;;  %p630_p8 = scmp.lt.u32.totalorder %s626_s10, %s902_s2 }
 0x116   :  { %p632_p9 = pnand %p630_p8, %p627_p7 }
 0x118   :  { %635 = shalt.err (!%p632_p9)
}
 0x119   :  { %533 = dma.vmem_to_hbm [thread:$0]  %s531_s6, 256, %s902_s2, [#allocation4]  }
 0x11a   :  { %640 = dma.done.wait [#allocation4], 256  }
 0x11b   :  { %641 = vsyncadd [#allocation4], 4294967040 }
 0x11c   :  { %537 = vsyncpa [#allocation3], 1 }
 0x11d   :  { %538 = vsyncpa [#allocation6], 1 }
 0x11e   :  { %539 = vsyncpa [#allocation4], 1 }

</bundles_post_ra>
